<compile_context>
chip_gen: v7x
topology: tpu7x:2x2x1
jax: 0.10.0
libtpu: 0.0.40
codegen_flags: <defaults>
</compile_context>

<pallas_src>
import functools

import jax
import jax.numpy as jnp
from jax.experimental import pallas as pl
from jax.experimental.pallas import tpu as pltpu

NUM_CLASSES = 5


def _round_up(n, m):
    return (n + m - 1) // m * m


def _pick_tb(batch8):
    """Batch tile size. `batch8` is already a multiple of 8."""
    TB_CAP = 16384  # x tile = 2 MiB at D=32; double-buffered it fits every gen's scoped VMEM
    if batch8 <= 1024:
        return batch8  # single exact tile
    # >= 2 lane-aligned (multiple-of-128) tiles so the "parallel" batch axis can
    # shard across v7x's two TensorCores; larger tiles amortize the ~0.35 us
    # per-grid-step overhead on v5e/v6e.
    tb = _round_up(pl.cdiv(batch8, 2), 128)
    return min(tb, TB_CAP)


def _fwd_kernel(x_ref, w_ref, b_ref, ypred_ref):
    # z = W^T x^T -> (C, TB): class on sublanes, batch on lanes (lane-dense).
    z = jax.lax.dot_general(
        w_ref[...], x_ref[...],
        dimension_numbers=(((0,), (1,)), ((), ())),
        preferred_element_type=jnp.float32,
    )
    z = z + b_ref[...]  # (C, TB) + (C, 1)
    # sigmoid(z) == 0.5*(tanh(z/2)+1): one EUP op, no full-precision divide.
    ypred_ref[...] = 0.5 * (jnp.tanh(0.5 * z) + 1.0)


def _loss_kernel(x_ref, w_ref, b_ref, y_ref, loss_ref, *, batch, tile, classes):
    i = pl.program_id(0)
    z = jax.lax.dot_general(
        w_ref[...], x_ref[...],
        dimension_numbers=(((0,), (1,)), ((), ())),
        preferred_element_type=jnp.float32,
    )
    z = z + b_ref[...]
    p = 0.5 * (jnp.tanh(0.5 * z) + 1.0)  # (C, TB) sigmoid outputs
    # CrossEntropyLoss(y_pred, y) == mean_i[ logsumexp(p_i) - p_i[y_i] ], with
    # the sigmoid outputs treated as logits (faithful to the PyTorch module).
    # p in (0,1) so the logsumexp needs no max-shift.
    lse = jnp.log(jnp.sum(jnp.exp(p), axis=0, keepdims=True))  # (1, TB)
    cls = jax.lax.broadcasted_iota(jnp.int32, (classes, tile), 0)
    picked = jnp.sum(jnp.where(cls == y_ref[...], p, 0.0), axis=0, keepdims=True)  # (1, TB)
    # Mask rows that are only batch padding (partial last block / pad-to-8).
    # Use where (not multiply): padded-block data is undefined and 0*NaN = NaN.
    col = jax.lax.broadcasted_iota(jnp.int32, (1, tile), 1) + i * tile
    per_row = jnp.where(col < batch, lse - picked, 0.0)
    partial = jnp.sum(per_row)
    # Lane-dense (1, 8, 128) per-tile partial-sum block -> unmasked store; the
    # wrapper reads [:, 0, 0] and finishes the mean.
    loss_ref[...] = jnp.full(loss_ref.shape, partial, dtype=jnp.float32)


def torch_model_forward(x, w, b, y=None):
    """Pallas equivalent of TorchModel.forward.

    x: (B, D) float32
    w: (D, C) float32  (transposed relative to PyTorch nn.Linear.weight)
    b: (C,)   float32
    y: optional (B,) int32 class indices in [0, C)
    """
    B, D = x.shape
    C = w.shape[1]

    # Only pad x when B is not a multiple of 8 (sublane alignment); at most 7 rows.
    B8 = _round_up(B, 8)
    x_p = x if B8 == B else jnp.pad(x, ((0, B8 - B), (0, 0)))

    TB = _pick_tb(B8)
    G = pl.cdiv(B8, TB)
    B_out = G * TB  # padded lane extent of the (C, B_out) output / label row

    b2 = b.reshape(C, 1).astype(jnp.float32)
    params = pltpu.CompilerParams(dimension_semantics=("parallel",))

    if y is None:
        yp_t = pl.pallas_call(
            _fwd_kernel,
            out_shape=jax.ShapeDtypeStruct((C, B_out), jnp.float32),
            grid=(G,),
            in_specs=[
                pl.BlockSpec((TB, D), lambda i: (i, 0)),  # x tile, pipelined
                pl.BlockSpec((D, C), lambda i: (0, 0)),   # W resident in VMEM
                pl.BlockSpec((C, 1), lambda i: (0, 0)),   # b resident in VMEM
            ],
            out_specs=pl.BlockSpec((C, TB), lambda i: (0, i)),  # lane-dense output
            compiler_params=params,
            cost_estimate=pl.CostEstimate(
                flops=2 * B8 * D * C,
                transcendentals=B8 * C,
                bytes_accessed=4 * (B8 * D + D * C + C + C * B_out),
            ),
        )(x_p, w, b2)
        # Crop the batch padding and transpose the tiny (C, B) result back.
        return yp_t[:, :B].T

    y_i32 = y.astype(jnp.int32)
    y_p = y_i32 if B_out == B else jnp.pad(y_i32, (0, B_out - B))
    y_p = y_p.reshape(1, B_out)

    partials = pl.pallas_call(
        functools.partial(_loss_kernel, batch=B, tile=TB, classes=C),
        out_shape=jax.ShapeDtypeStruct((G, 8, 128), jnp.float32),
        grid=(G,),
        in_specs=[
            pl.BlockSpec((TB, D), lambda i: (i, 0)),  # x tile, pipelined
            pl.BlockSpec((D, C), lambda i: (0, 0)),   # W resident
            pl.BlockSpec((C, 1), lambda i: (0, 0)),   # b resident
            pl.BlockSpec((1, TB), lambda i: (0, i)),  # raw int labels (no one-hot)
        ],
        out_specs=pl.BlockSpec((1, 8, 128), lambda i: (i, 0, 0)),
        compiler_params=params,
        cost_estimate=pl.CostEstimate(
            flops=2 * B8 * D * C,
            transcendentals=2 * B8 * C,
            bytes_accessed=4 * (B8 * D + D * C + C + B_out) + 4 * G * 8 * 128,
        ),
    )(x_p, w, b2, y_p)

    # Final mean over the per-tile partial sums (a handful of scalars).
    return jnp.sum(partials[:, 0, 0]) / B


def _reference_forward(x, w, b, y=None):
    z = x @ w + b
    p = jax.nn.sigmoid(z)
    if y is None:
        return p
    logp = jax.nn.log_softmax(p, axis=-1)
    return -jnp.mean(jnp.take_along_axis(logp, y[:, None], axis=-1))


if __name__ == "__main__":
    key = jax.random.PRNGKey(0)
    kx, kw, kb, ky, kx2, ky2, kx3, ky3 = jax.random.split(key, 8)

    # --- small case matching the module spec: batch=8, input_size=32, 5 classes
    B, D = 8, 32
    x = jax.random.normal(kx, (B, D), dtype=jnp.float32)
    w = jax.random.normal(kw, (D, NUM_CLASSES), dtype=jnp.float32) / jnp.sqrt(D)
    b = jax.random.normal(kb, (NUM_CLASSES,), dtype=jnp.float32) * 0.1
    y = jax.random.randint(ky, (B,), 0, NUM_CLASSES, dtype=jnp.int32)

    y_pred = jax.block_until_ready(torch_model_forward(x, w, b))
    loss = jax.block_until_ready(torch_model_forward(x, w, b, y))

    assert y_pred.shape == (B, NUM_CLASSES)
    assert jnp.allclose(y_pred, _reference_forward(x, w, b), atol=1e-4, rtol=1e-4)
    assert jnp.allclose(loss, _reference_forward(x, w, b, y), atol=1e-4, rtol=1e-4)

    # --- mid batch: single tile (G=1), exact blocks
    B2 = 1000
    x2 = jax.random.normal(kx2, (B2, D), dtype=jnp.float32)
    y2 = jax.random.randint(ky2, (B2,), 0, NUM_CLASSES, dtype=jnp.int32)

    y_pred2 = jax.block_until_ready(torch_model_forward(x2, w, b))
    loss2 = jax.block_until_ready(torch_model_forward(x2, w, b, y2))

    assert y_pred2.shape == (B2, NUM_CLASSES)
    assert jnp.allclose(y_pred2, _reference_forward(x2, w, b), atol=1e-4, rtol=1e-4)
    assert jnp.allclose(loss2, _reference_forward(x2, w, b, y2), atol=1e-4, rtol=1e-4)

    # --- larger batch: exercises G=2 tiles, a partial last block and row masking
    B3 = 3000
    x3 = jax.random.normal(kx3, (B3, D), dtype=jnp.float32)
    y3 = jax.random.randint(ky3, (B3,), 0, NUM_CLASSES, dtype=jnp.int32)

    y_pred3 = jax.block_until_ready(torch_model_forward(x3, w, b))
    loss3 = jax.block_until_ready(torch_model_forward(x3, w, b, y3))

    assert y_pred3.shape == (B3, NUM_CLASSES)
    assert jnp.allclose(y_pred3, _reference_forward(x3, w, b), atol=1e-4, rtol=1e-4)
    assert jnp.allclose(loss3, _reference_forward(x3, w, b, y3), atol=1e-4, rtol=1e-4)

    print("KERNEL_OK")
</pallas_src>

<mosaic_0001>
module attributes {stable_mosaic.version = 11 : i64} {
  func.func @_fwd_kernel(%arg0: i32, %arg1: memref<8x32xf32, #tpu.memory_space<vmem>>, %arg2: memref<32x5xf32, #tpu.memory_space<vmem>>, %arg3: memref<5x1xf32, #tpu.memory_space<vmem>>, %arg4: memref<5x8xf32, #tpu.memory_space<vmem>>) attributes {dimension_semantics = [#tpu.dimension_semantics<parallel>], iteration_bounds = array<i64: 1>, scalar_prefetch = 0 : i64, scratch_operands = 0 : i64, tpu.core_type = #tpu.core_type<tc>, window_params = [{transform_indices = @transform_0, window_bounds = array<i64: 8, 32>}, {pipeline_mode = #tpu.pipeline_mode<synchronous>, transform_indices = @transform_1, window_bounds = array<i64: 32, 5>}, {pipeline_mode = #tpu.pipeline_mode<synchronous>, transform_indices = @transform_2, window_bounds = array<i64: 5, 1>}, {transform_indices = @transform_3, window_bounds = array<i64: 5, 8>}]} {
    %c0 = arith.constant 0 : index
    %c0_0 = arith.constant 0 : index
    %0 = vector.load %arg2[%c0, %c0_0] : memref<32x5xf32, #tpu.memory_space<vmem>>, vector<32x5xf32>
    %c0_1 = arith.constant 0 : index
    %c0_2 = arith.constant 0 : index
    %1 = vector.load %arg1[%c0_1, %c0_2] : memref<8x32xf32, #tpu.memory_space<vmem>>, vector<8x32xf32>
    %cst = arith.constant dense<0.000000e+00> : vector<5x8xf32>
    %2 = tpu.matmul %0, %1, %cst {dimension_numbers = #tpu.dot_dimension_numbers<[0], [1], [1], [0], [0, 1, 1, 0], [], []>} : vector<32x5xf32>, vector<8x32xf32>, vector<5x8xf32> -> vector<5x8xf32>
    %c0_3 = arith.constant 0 : index
    %c0_4 = arith.constant 0 : index
    %3 = vector.load %arg3[%c0_3, %c0_4] : memref<5x1xf32, #tpu.memory_space<vmem>>, vector<5x1xf32>
    %4 = vector.broadcast %3 : vector<5x1xf32> to vector<5x8xf32>
    %5 = arith.addf %2, %4 : vector<5x8xf32>
    %cst_5 = arith.constant 5.000000e-01 : f32
    %6 = vector.broadcast %cst_5 : f32 to vector<5x8xf32>
    %7 = arith.mulf %6, %5 : vector<5x8xf32>
    %8 = math.tanh %7 : vector<5x8xf32>
    %cst_6 = arith.constant 1.000000e+00 : f32
    %9 = vector.broadcast %cst_6 : f32 to vector<5x8xf32>
    %10 = arith.addf %8, %9 : vector<5x8xf32>
    %cst_7 = arith.constant 5.000000e-01 : f32
    %11 = vector.broadcast %cst_7 : f32 to vector<5x8xf32>
    %12 = arith.mulf %11, %10 : vector<5x8xf32>
    %c0_8 = arith.constant 0 : index
    %c0_9 = arith.constant 0 : index
    %13 = vector.load %arg4[%c0_8, %c0_9] : memref<5x8xf32, #tpu.memory_space<vmem>>, vector<5x8xf32>
    tpu.vector_store %arg4[%c0_8, %c0_9], %12 {strides = array<i32>} : memref<5x8xf32, #tpu.memory_space<vmem>>, vector<5x8xf32>,
    return
  }
  func.func @transform_0(%arg0: i32) -> (i32, i32) {
    %c0_i32 = arith.constant 0 : i32
    %c0_i32_0 = arith.constant 0 : i32
    return %arg0, %c0_i32 : i32, i32
  }
  func.func @transform_1(%arg0: i32) -> (i32, i32) {
    %c0_i32 = arith.constant 0 : i32
    %c0_i32_0 = arith.constant 0 : i32
    %c0_i32_1 = arith.constant 0 : i32
    return %c0_i32, %c0_i32_0 : i32, i32
  }
  func.func @transform_2(%arg0: i32) -> (i32, i32) {
    %c0_i32 = arith.constant 0 : i32
    %c0_i32_0 = arith.constant 0 : i32
    %c0_i32_1 = arith.constant 0 : i32
    return %c0_i32, %c0_i32_0 : i32, i32
  }
  func.func @transform_3(%arg0: i32) -> (i32, i32) {
    %c0_i32 = arith.constant 0 : i32
    %c0_i32_0 = arith.constant 0 : i32
    return %c0_i32, %arg0 : i32, i32
  }
}

</mosaic_0001>

<bundles_post_ra>
// kernel: tpu_custom_call.1
= control target key start
LH: loop header
LB: loop body
LE: loop exit
PB: predicated region body
PF: predicated region fallthrough
CT: control target
= control target key end

     0   :  { %vm58_vm0 = vcmask 261120   ;;  %v196_v1 = vmov 0.0   ;;  %s252_s0 = inlined_call_operand.vmem [shape: f32[8,32], index: 0, kind: input, shape index: {}]   ;;  %s253_s1 = inlined_call_operand.vmem [shape: f32[32,5], index: 1, kind: input, shape index: {}]   ;;  %s254_s2 = inlined_call_operand.vmem [shape: f32[5,1], index: 2, kind: input, shape index: {}]   ;;  %s255_s3 = inlined_call_operand.hbm [shape: f32[5,8], index: 3, kind: output, shape index: {}]  }
   0x1   :  { %v15_v0 = vld [vmem:[%s253_s1] sm:$0xff]  ;;  %159 = vmatprep.subr.mxu0 %v196_v1 }
   0x2   :  { %26 = vxpose.xlu0.b32.start [1/4] (short) (narrow) %v15_v0, 8  ;;  %v19_v2 = vld [vmem:[%s252_s0] sm:$0xff] }
   0x3   :  { %8 = vsyncpa [#allocation3], 0  ;;  %v16_v3 = vld [vmem:[%s253_s1 + $0x8] sm:$0xff]  ;;  %160 = vmatpush3.xpose.msk.msra.mxu0 %vm58_vm0, %v19_v2  ;;  %vm197_vm1 = vmmov 0   ;;  %v20_v4 = vld [vmem:[%s254_s2] sm:$0x1f] }
   0x4   :  { %161 = vmatprep.mubr.msk.f32.mxu0 %vm197_vm1, %v196_v1  ;;  %v198_v5 = vmov 0   ;;  %v17_v6 = vld [vmem:[%s253_s1 + $0x10] sm:$0xff]  ;;  %v18_v7 = vld [vmem:[%s253_s1 + $0x18] sm:$0xff]  ;;  %s199_s2 = smov [#allocation2]   ;;  %vm139_vm2 = vcmask 61440  }
   0x5   :  { %168 = vset.pattern.permute.xlu1 %v198_v5  ;;  %s147_s23 = sshll.u32 %s199_s2, 4  ;;  %s148_s23 = int_to_ptr.vmem [resolvable:$true] %s147_s23 }
   0x6   :  { %23 = vperm.xlu1 %168, %v20_v4   ;;  %27 = vxpose.xlu0.b32.cont [2/4] (short) (narrow) %v16_v3, 8  ;;  %s172_s1 = scalar_lea.vmem %s148_s23, 128  ;;  %p177_p1 = scmp.lt.s32.totalorder %s148_s23, %s148_s23 }
   0x7   :  { %p173_p0 = scmp.ne.s32.totalorder %s148_s23, %s172_s1  ;;  %p178_p2 = scmp.lt.s32.totalorder %s172_s1, %s172_s1 }
   0x9   :  { %p179_p3 = por %p178_p2, %p177_p1 }
   0xa   :  { %28 = vxpose.xlu0.b32.cont [3/4] (short) (narrow) %v17_v6, 8 }
   0xb   :  { %p180_p4 = pnand %p179_p3, %p173_p0 }
   0xe   :  { %29 = vxpose.xlu0.b32.end [4/4] (short) (narrow) %v18_v7, 8 }
  0x37   :  { %169 = vset.pattern.permute.xlu0 %v198_v5 }
  0x82   :  { %v42_v8 = vpop.trf.xlu0 }
  0x83   :  { %162 = vmatmul.mubr.msk.f32.vlgmr.msra.gmra.mrb[0].mxu0 %vm58_vm0, %v42_v8 }
  0x85   :  { %v24_v9 = vpop.permute.xlu1 %23 }
 0x156   :  { %v131_v10 = vpop.f32.mrb[0].mxu0 }
 0x157   :  { %v132_v11 = vadd.f32 %v131_v10, %v24_v9  ;;  %v163_v12 = vpop.f32.mrb[1].mxu0 }
 0x159   :  { %v135_v13 = vmul.f32 0.5, %v132_v11 }
 0x15b   :  { %170 = vtanh.f32 %v135_v13 }
 0x165   :  { %v171_v14 = vpop.eup %170 }
 0x166   :  { %v137_v15 = vadd.f32 1.0, %v171_v14 }
 0x168   :  { %v138_v16 = vmul.f32 0.5, %v137_v15 }
 0x16a   :  { %140 = vst.msk [vmem:[#allocation2] sm:$0x1f] %vm139_vm2, %v138_v16 }
 0x16b   :  { %183 = shalt.err (!%p180_p4)
}
 0x16c   :  { %s184_s26 = scalar_lea.hbm %s255_s3, 128 }
 0x16d   :  { %p185_p5 = scmp.ne.s32.totalorder %s255_s3, %s184_s26  ;;  %p188_p6 = scmp.lt.u32.totalorder %s184_s26, %s255_s3 }
 0x16f   :  { %p190_p7 = pnand %p188_p6, %p185_p5 }
 0x171   :  { %193 = shalt.err (!%p190_p7)
}
 0x172   :  { %150 = dma.vmem_to_hbm [thread:$0]  %s148_s23, 128, %s255_s3, [#allocation3]  }
 0x173   :  { %194 = dma.done.wait [#allocation3], 128  }
 0x174   :  { %195 = vsyncadd [#allocation3], 4294967168 }
 0x175   :  { %154 = vsyncpa [#allocation3], 1 }

</bundles_post_ra>
